<compile_context>
chip_gen: v7x
topology: tpu7x:2x2x1
jax: 0.10.0
libtpu: 0.0.40
codegen_flags: <defaults>
</compile_context>

<pallas_src>
import functools

import jax
import jax.numpy as jnp
from jax.experimental import pallas as pl
from jax.experimental.pallas import tpu as pltpu


# ----------------------------------------------------------------------------
# Pallas kernel: fused kernel_gen conv + involution + pointwise conv
# Layout: channels on sublanes, pixels (N) on lanes.
# ----------------------------------------------------------------------------
def _involution_kernel(patches_ref, wkg_ref, bkg_ref, wpw_ref, bpw_ref, out_ref,
                       *, K, C, G):
    KK = K * K
    Cg = C // G
    tn = patches_ref.shape[2]           # lane-tile of N (multiple of 128)
    KKG_pad = wkg_ref.shape[1]

    # 1) per-pixel kernel generation: grouped KxK conv expressed as KK small
    #    matmuls (KKG_pad, C) x (C, tn) -> (KKG_pad, tn); bf16 in, f32 acc.
    ker = jnp.zeros((KKG_pad, tn), jnp.float32)
    for k in range(KK):
        ker = ker + jnp.dot(wkg_ref[k], patches_ref[k],
                            preferred_element_type=jnp.float32)
    ker = ker + bkg_ref[...]                               # (KKG_pad, tn)

    # 2) involution: inv[c, n] = sum_k patch[k, c, n] * ker[(c//Cg)*KK + k, n]
    #    elementwise work stays in f32 (VPU native on all generations).
    inv = jnp.zeros((C, tn), jnp.float32)
    if G == 1:
        for k in range(KK):
            inv = inv + patches_ref[k].astype(jnp.float32) * ker[k:k + 1, :]
    else:
        # general grouped path (not exercised by the demo config)
        for k in range(KK):
            p = patches_ref[k].astype(jnp.float32)
            scale = jnp.concatenate(
                [jnp.broadcast_to(ker[g * KK + k:g * KK + k + 1, :], (Cg, tn))
                 for g in range(G)], axis=0)
            inv = inv + p * scale

    # 3) pointwise (1x1 grouped) conv as one lane-dense matmul:
    #    (C_out_pad, C) x (C, tn) -> (C_out_pad, tn); unmasked full-lane store.
    out = jnp.dot(wpw_ref[...], inv.astype(jnp.bfloat16),
                  preferred_element_type=jnp.float32) + bpw_ref[...]
    out_ref[...] = out.astype(out_ref.dtype)


# ----------------------------------------------------------------------------
# Wrapper: window extraction, weight repacking, pallas_call, reshape to NCHW
# ----------------------------------------------------------------------------
def involution_conv2d(x, wkg, bkg, wpw, bpw, *, kernel_size=3, stride=1,
                      groups=1, tile_n=2048, storage_dtype=jnp.bfloat16):
    B, C, H, W = x.shape
    K = kernel_size
    KK = K * K
    G = groups
    Cg = C // G
    C_out = wpw.shape[0]
    Cog = C_out // G
    pad = K // 2
    Ho = (H + 2 * pad - K) // stride + 1
    Wo = (W + 2 * pad - K) // stride + 1
    N = B * Ho * Wo

    def rup(a, b):
        return ((a + b - 1) // b) * b

    # --- window extraction: patches as (KK, C, N), channel-first, bf16 -------
    x_cf = jnp.transpose(x, (1, 0, 2, 3)).astype(storage_dtype)   # (C,B,H,W)
    xp = jnp.pad(x_cf, ((0, 0), (0, 0), (pad, pad), (pad, pad)))
    slabs = []
    for kh in range(K):
        for kw in range(K):
            s = xp[:, :, kh: kh + stride * (Ho - 1) + 1: stride,
                         kw: kw + stride * (Wo - 1) + 1: stride]   # (C,B,Ho,Wo)
            slabs.append(s.reshape(C, N))
    patches = jnp.stack(slabs, axis=0)                             # (KK, C, N)

    # --- repack kernel_gen weight (KK*G, Cg, K, K) -> (KK_in, KKG_pad, C) ----
    KKG_pad = rup(KK * G, 8)                                 # sublane-aligned
    wkg_re = jnp.zeros((KK, KKG_pad, C), jnp.float32)
    for g in range(G):
        blk = wkg[g * KK:(g + 1) * KK]                      # (KK_out, Cg, K, K)
        blk = jnp.transpose(blk, (2, 3, 0, 1)).reshape(KK, KK, Cg)  # (kin,kout,cg)
        wkg_re = wkg_re.at[:, g * KK:(g + 1) * KK,
                           g * Cg:(g + 1) * Cg].set(blk)
    wkg_re = wkg_re.astype(storage_dtype)
    bkg2 = jnp.zeros((KKG_pad, 1), jnp.float32).at[:KK * G, 0].set(bkg)

    # --- repack pointwise weight (C_out, Cg, 1, 1) -> dense (C_out_pad, C) ---
    C_out_pad = rup(C_out, 8)
    wpw_full = jnp.zeros((C_out_pad, C), jnp.float32)
    for g in range(G):
        blk = wpw[g * Cog:(g + 1) * Cog, :, 0, 0]            # (Cog, Cg)
        wpw_full = wpw_full.at[g * Cog:(g + 1) * Cog,
                               g * Cg:(g + 1) * Cg].set(blk)
    wpw_full = wpw_full.astype(storage_dtype)
    bpw_full = jnp.zeros((C_out_pad, 1), jnp.float32).at[:C_out, 0].set(bpw)

    # --- tile selection: big lane tiles, VMEM-budgeted, grid >= 2 if possible
    try:
        vmem_cap = int(getattr(pltpu.get_tpu_info(), "vmem_capacity_bytes",
                               64 * 1024 * 1024))
    except Exception:
        vmem_cap = 64 * 1024 * 1024
    in_isz = jnp.dtype(storage_dtype).itemsize
    out_isz = jnp.dtype(x.dtype).itemsize
    # double-buffered streaming bytes per lane column (patches in + output out)
    bytes_per_col = 2 * KK * C * in_isz + 2 * C_out_pad * out_isz
    weight_bytes = ((KK * KKG_pad * C + C_out_pad * C) * in_isz
                    + (KKG_pad + C_out_pad) * 4)
    budget = int(vmem_cap * 0.4)
    tn_cap = max(128, ((budget - 2 * weight_bytes) // max(bytes_per_col, 1))
                 // 128 * 128)

    tn = min(tile_n, rup(max(N // 2, 1), 128), tn_cap)   # >= 2 grid steps
    tn = max(tn, 128)                                    # lane-dense tiles
    N_pad = rup(N, tn)
    grid = (N_pad // tn,)

    if N_pad != N:
        patches = jnp.pad(patches, ((0, 0), (0, 0), (0, N_pad - N)))

    vmem_limit = int(min(vmem_cap,
                         max(32 * 1024 * 1024,
                             2 * weight_bytes + bytes_per_col * tn
                             + (4 << 20))))

    out_flat = pl.pallas_call(
        functools.partial(_involution_kernel, K=K, C=C, G=G),
        out_shape=jax.ShapeDtypeStruct((C_out_pad, N_pad), x.dtype),
        grid=grid,
        in_specs=[
            pl.BlockSpec((KK, C, tn), lambda i: (0, 0, i)),        # patches
            pl.BlockSpec((KK, KKG_pad, C), lambda i: (0, 0, 0)),   # W_kg (bf16)
            pl.BlockSpec((KKG_pad, 1), lambda i: (0, 0)),          # b_kg (f32)
            pl.BlockSpec((C_out_pad, C), lambda i: (0, 0)),        # W_pw (bf16)
            pl.BlockSpec((C_out_pad, 1), lambda i: (0, 0)),        # b_pw (f32)
        ],
        out_specs=pl.BlockSpec((C_out_pad, tn), lambda i: (0, i)),
        compiler_params=pltpu.CompilerParams(
            dimension_semantics=("parallel",),
            vmem_limit_bytes=vmem_limit),
    )(patches, wkg_re, bkg2, wpw_full, bpw_full)

    out = (out_flat[:C_out, :N]
           .reshape(C_out, B, Ho, Wo)
           .transpose(1, 0, 2, 3))
    return out


# ----------------------------------------------------------------------------
# Pure-JAX reference (mirrors the PyTorch forward exactly)
# ----------------------------------------------------------------------------
def involution_conv2d_ref(x, wkg, bkg, wpw, bpw, *, kernel_size=3, stride=1,
                          groups=1):
    B, C, H, W = x.shape
    K = kernel_size
    KK = K * K
    pad = K // 2
    kernel = jax.lax.conv_general_dilated(
        x, wkg, window_strides=(stride, stride),
        padding=[(pad, pad), (pad, pad)], feature_group_count=groups,
        dimension_numbers=("NCHW", "OIHW", "NCHW")) + bkg[None, :, None, None]
    _, _, Ho, Wo = kernel.shape
    kernel = kernel.reshape(B, groups, KK, Ho, Wo)

    xp = jnp.pad(x, ((0, 0), (0, 0), (pad, pad), (pad, pad)))
    slices = []
    for kh in range(K):
        for kw in range(K):
            slices.append(xp[:, :,
                             kh: kh + stride * (Ho - 1) + 1: stride,
                             kw: kw + stride * (Wo - 1) + 1: stride])
    xu = jnp.stack(slices, axis=2)                     # (B, C, KK, Ho, Wo)
    xu = xu.reshape(B, groups, C // groups, KK, Ho, Wo)
    out = (xu * kernel[:, :, None]).sum(axis=3).reshape(B, C, Ho, Wo)
    out = jax.lax.conv_general_dilated(
        out, wpw, (1, 1), "VALID", feature_group_count=groups,
        dimension_numbers=("NCHW", "OIHW", "NCHW")) + bpw[None, :, None, None]
    return out


if __name__ == "__main__":
    # Module config (PyTorch: InvolutionConv2D(in_channels=8, out_channels=16))
    B, C_in, H, W = 2, 8, 16, 16
    C_out, K, STRIDE, GROUPS = 16, 3, 1, 1
    KK = K * K

    key = jax.random.PRNGKey(0)
    kx, k1, k2, k3, k4 = jax.random.split(key, 5)
    x = jax.random.normal(kx, (B, C_in, H, W), jnp.float32)
    # kernel_gen: Conv2d(C_in, KK*G, K, stride, pad=K//2, groups=G)
    wkg = jax.random.normal(k1, (KK * GROUPS, C_in // GROUPS, K, K), jnp.float32) * 0.1
    bkg = jax.random.normal(k2, (KK * GROUPS,), jnp.float32) * 0.1
    # pointwise_conv: Conv2d(C_in, C_out, 1, groups=G)
    wpw = jax.random.normal(k3, (C_out, C_in // GROUPS, 1, 1), jnp.float32) * 0.1
    bpw = jax.random.normal(k4, (C_out,), jnp.float32) * 0.1

    out = involution_conv2d(x, wkg, bkg, wpw, bpw,
                            kernel_size=K, stride=STRIDE, groups=GROUPS)
    out = jax.block_until_ready(out)

    # Reference evaluated on bf16-round-tripped activations/weights: the kernel
    # stores these streams in bf16 (f32 accumulation), so this compares the
    # same quantized problem; remaining diff is accumulation order + one bf16
    # rounding of the involution intermediate before the pointwise matmul.
    q = lambda a: a.astype(jnp.bfloat16).astype(jnp.float32)
    ref = involution_conv2d_ref(q(x), q(wkg), bkg, q(wpw), bpw,
                                kernel_size=K, stride=STRIDE, groups=GROUPS)
    ref = jax.block_until_ready(ref)

    assert out.shape == (B, C_out, H, W), out.shape
    max_err = float(jnp.max(jnp.abs(out - ref)))
    assert jnp.allclose(out, ref, atol=2e-2, rtol=2e-2), max_err
    print("KERNEL_OK")
</pallas_src>

<mosaic_0001>
module attributes {stable_mosaic.version = 11 : i64} {
  func.func @_involution_kernel(%arg0: i32, %arg1: memref<9x8x256xbf16, #tpu.memory_space<vmem>>, %arg2: memref<9x16x8xbf16, #tpu.memory_space<vmem>>, %arg3: memref<16x1xf32, #tpu.memory_space<vmem>>, %arg4: memref<16x8xbf16, #tpu.memory_space<vmem>>, %arg5: memref<16x1xf32, #tpu.memory_space<vmem>>, %arg6: memref<16x256xf32, #tpu.memory_space<vmem>>) attributes {dimension_semantics = [#tpu.dimension_semantics<parallel>], iteration_bounds = array<i64: 2>, scalar_prefetch = 0 : i64, scratch_operands = 0 : i64, tpu.core_type = #tpu.core_type<tc>, window_params = [{transform_indices = @transform_0, window_bounds = array<i64: 9, 8, 256>}, {pipeline_mode = #tpu.pipeline_mode<synchronous>, transform_indices = @transform_1, window_bounds = array<i64: 9, 16, 8>}, {pipeline_mode = #tpu.pipeline_mode<synchronous>, transform_indices = @transform_2, window_bounds = array<i64: 16, 1>}, {pipeline_mode = #tpu.pipeline_mode<synchronous>, transform_indices = @transform_3, window_bounds = array<i64: 16, 8>}, {pipeline_mode = #tpu.pipeline_mode<synchronous>, transform_indices = @transform_4, window_bounds = array<i64: 16, 1>}, {transform_indices = @transform_5, window_bounds = array<i64: 16, 256>}]} {
    %cst = arith.constant 0.000000e+00 : f32
    %0 = vector.broadcast %cst : f32 to vector<16x256xf32>
    %c0 = arith.constant 0 : index
    %c0_0 = arith.constant 0 : index
    %c0_1 = arith.constant 0 : index
    %1 = vector.load %arg2[%c0, %c0_0, %c0_1] : memref<9x16x8xbf16, #tpu.memory_space<vmem>>, vector<1x16x8xbf16>
    %2 = vector.shape_cast %1 : vector<1x16x8xbf16> to vector<16x8xbf16>
    %c0_2 = arith.constant 0 : index
    %c0_3 = arith.constant 0 : index
    %c0_4 = arith.constant 0 : index
    %3 = vector.load %arg1[%c0_2, %c0_3, %c0_4] : memref<9x8x256xbf16, #tpu.memory_space<vmem>>, vector<1x8x256xbf16>
    %4 = vector.shape_cast %3 : vector<1x8x256xbf16> to vector<8x256xbf16>
    %cst_5 = arith.constant dense<0.000000e+00> : vector<16x256xf32>
    %5 = tpu.matmul %2, %4, %cst_5 {dimension_numbers = #tpu.dot_dimension_numbers<[1], [0], [0], [1], [0, 0, 1, 1], [], []>} : vector<16x8xbf16>, vector<8x256xbf16>, vector<16x256xf32> -> vector<16x256xf32>
    %6 = arith.addf %0, %5 : vector<16x256xf32>
    %c1 = arith.constant 1 : index
    %c0_6 = arith.constant 0 : index
    %c0_7 = arith.constant 0 : index
    %7 = vector.load %arg2[%c1, %c0_6, %c0_7] : memref<9x16x8xbf16, #tpu.memory_space<vmem>>, vector<1x16x8xbf16>
    %8 = vector.shape_cast %7 : vector<1x16x8xbf16> to vector<16x8xbf16>
    %c1_8 = arith.constant 1 : index
    %c0_9 = arith.constant 0 : index
    %c0_10 = arith.constant 0 : index
    %9 = vector.load %arg1[%c1_8, %c0_9, %c0_10] : memref<9x8x256xbf16, #tpu.memory_space<vmem>>, vector<1x8x256xbf16>
    %10 = vector.shape_cast %9 : vector<1x8x256xbf16> to vector<8x256xbf16>
    %cst_11 = arith.constant dense<0.000000e+00> : vector<16x256xf32>
    %11 = tpu.matmul %8, %10, %cst_11 {dimension_numbers = #tpu.dot_dimension_numbers<[1], [0], [0], [1], [0, 0, 1, 1], [], []>} : vector<16x8xbf16>, vector<8x256xbf16>, vector<16x256xf32> -> vector<16x256xf32>
    %12 = arith.addf %6, %11 : vector<16x256xf32>
    %c2 = arith.constant 2 : index
    %c0_12 = arith.constant 0 : index
    %c0_13 = arith.constant 0 : index
    %13 = vector.load %arg2[%c2, %c0_12, %c0_13] : memref<9x16x8xbf16, #tpu.memory_space<vmem>>, vector<1x16x8xbf16>
    %14 = vector.shape_cast %13 : vector<1x16x8xbf16> to vector<16x8xbf16>
    %c2_14 = arith.constant 2 : index
    %c0_15 = arith.constant 0 : index
    %c0_16 = arith.constant 0 : index
    %15 = vector.load %arg1[%c2_14, %c0_15, %c0_16] : memref<9x8x256xbf16, #tpu.memory_space<vmem>>, vector<1x8x256xbf16>
    %16 = vector.shape_cast %15 : vector<1x8x256xbf16> to vector<8x256xbf16>
    %cst_17 = arith.constant dense<0.000000e+00> : vector<16x256xf32>
    %17 = tpu.matmul %14, %16, %cst_17 {dimension_numbers = #tpu.dot_dimension_numbers<[1], [0], [0], [1], [0, 0, 1, 1], [], []>} : vector<16x8xbf16>, vector<8x256xbf16>, vector<16x256xf32> -> vector<16x256xf32>
    %18 = arith.addf %12, %17 : vector<16x256xf32>
    %c3 = arith.constant 3 : index
    %c0_18 = arith.constant 0 : index
    %c0_19 = arith.constant 0 : index
    %19 = vector.load %arg2[%c3, %c0_18, %c0_19] : memref<9x16x8xbf16, #tpu.memory_space<vmem>>, vector<1x16x8xbf16>
    %20 = vector.shape_cast %19 : vector<1x16x8xbf16> to vector<16x8xbf16>
    %c3_20 = arith.constant 3 : index
    %c0_21 = arith.constant 0 : index
    %c0_22 = arith.constant 0 : index
    %21 = vector.load %arg1[%c3_20, %c0_21, %c0_22] : memref<9x8x256xbf16, #tpu.memory_space<vmem>>, vector<1x8x256xbf16>
    %22 = vector.shape_cast %21 : vector<1x8x256xbf16> to vector<8x256xbf16>
    %cst_23 = arith.constant dense<0.000000e+00> : vector<16x256xf32>
    %23 = tpu.matmul %20, %22, %cst_23 {dimension_numbers = #tpu.dot_dimension_numbers<[1], [0], [0], [1], [0, 0, 1, 1], [], []>} : vector<16x8xbf16>, vector<8x256xbf16>, vector<16x256xf32> -> vector<16x256xf32>
    %24 = arith.addf %18, %23 : vector<16x256xf32>
    %c4 = arith.constant 4 : index
    %c0_24 = arith.constant 0 : index
    %c0_25 = arith.constant 0 : index
    %25 = vector.load %arg2[%c4, %c0_24, %c0_25] : memref<9x16x8xbf16, #tpu.memory_space<vmem>>, vector<1x16x8xbf16>
    %26 = vector.shape_cast %25 : vector<1x16x8xbf16> to vector<16x8xbf16>
    %c4_26 = arith.constant 4 : index
    %c0_27 = arith.constant 0 : index
    %c0_28 = arith.constant 0 : index
    %27 = vector.load %arg1[%c4_26, %c0_27, %c0_28] : memref<9x8x256xbf16, #tpu.memory_space<vmem>>, vector<1x8x256xbf16>
    %28 = vector.shape_cast %27 : vector<1x8x256xbf16> to vector<8x256xbf16>
    %cst_29 = arith.constant dense<0.000000e+00> : vector<16x256xf32>
    %29 = tpu.matmul %26, %28, %cst_29 {dimension_numbers = #tpu.dot_dimension_numbers<[1], [0], [0], [1], [0, 0, 1, 1], [], []>} : vector<16x8xbf16>, vector<8x256xbf16>, vector<16x256xf32> -> vector<16x256xf32>
    %30 = arith.addf %24, %29 : vector<16x256xf32>
    %c5 = arith.constant 5 : index
    %c0_30 = arith.constant 0 : index
    %c0_31 = arith.constant 0 : index
    %31 = vector.load %arg2[%c5, %c0_30, %c0_31] : memref<9x16x8xbf16, #tpu.memory_space<vmem>>, vector<1x16x8xbf16>
    %32 = vector.shape_cast %31 : vector<1x16x8xbf16> to vector<16x8xbf16>
    %c5_32 = arith.constant 5 : index
    %c0_33 = arith.constant 0 : index
    %c0_34 = arith.constant 0 : index
    %33 = vector.load %arg1[%c5_32, %c0_33, %c0_34] : memref<9x8x256xbf16, #tpu.memory_space<vmem>>, vector<1x8x256xbf16>
    %34 = vector.shape_cast %33 : vector<1x8x256xbf16> to vector<8x256xbf16>
    %cst_35 = arith.constant dense<0.000000e+00> : vector<16x256xf32>
    %35 = tpu.matmul %32, %34, %cst_35 {dimension_numbers = #tpu.dot_dimension_numbers<[1], [0], [0], [1], [0, 0, 1, 1], [], []>} : vector<16x8xbf16>, vector<8x256xbf16>, vector<16x256xf32> -> vector<16x256xf32>
    %36 = arith.addf %30, %35 : vector<16x256xf32>
    %c6 = arith.constant 6 : index
    %c0_36 = arith.constant 0 : index
    %c0_37 = arith.constant 0 : index
    %37 = vector.load %arg2[%c6, %c0_36, %c0_37] : memref<9x16x8xbf16, #tpu.memory_space<vmem>>, vector<1x16x8xbf16>
    %38 = vector.shape_cast %37 : vector<1x16x8xbf16> to vector<16x8xbf16>
    %c6_38 = arith.constant 6 : index
    %c0_39 = arith.constant 0 : index
    %c0_40 = arith.constant 0 : index
    %39 = vector.load %arg1[%c6_38, %c0_39, %c0_40] : memref<9x8x256xbf16, #tpu.memory_space<vmem>>, vector<1x8x256xbf16>
    %40 = vector.shape_cast %39 : vector<1x8x256xbf16> to vector<8x256xbf16>
    %cst_41 = arith.constant dense<0.000000e+00> : vector<16x256xf32>
    %41 = tpu.matmul %38, %40, %cst_41 {dimension_numbers = #tpu.dot_dimension_numbers<[1], [0], [0], [1], [0, 0, 1, 1], [], []>} : vector<16x8xbf16>, vector<8x256xbf16>, vector<16x256xf32> -> vector<16x256xf32>
    %42 = arith.addf %36, %41 : vector<16x256xf32>
    %c7 = arith.constant 7 : index
    %c0_42 = arith.constant 0 : index
    %c0_43 = arith.constant 0 : index
    %43 = vector.load %arg2[%c7, %c0_42, %c0_43] : memref<9x16x8xbf16, #tpu.memory_space<vmem>>, vector<1x16x8xbf16>
    %44 = vector.shape_cast %43 : vector<1x16x8xbf16> to vector<16x8xbf16>
    %c7_44 = arith.constant 7 : index
    %c0_45 = arith.constant 0 : index
    %c0_46 = arith.constant 0 : index
    %45 = vector.load %arg1[%c7_44, %c0_45, %c0_46] : memref<9x8x256xbf16, #tpu.memory_space<vmem>>, vector<1x8x256xbf16>
    %46 = vector.shape_cast %45 : vector<1x8x256xbf16> to vector<8x256xbf16>
    %cst_47 = arith.constant dense<0.000000e+00> : vector<16x256xf32>
    %47 = tpu.matmul %44, %46, %cst_47 {dimension_numbers = #tpu.dot_dimension_numbers<[1], [0], [0], [1], [0, 0, 1, 1], [], []>} : vector<16x8xbf16>, vector<8x256xbf16>, vector<16x256xf32> -> vector<16x256xf32>
    %48 = arith.addf %42, %47 : vector<16x256xf32>
    %c8 = arith.constant 8 : index
    %c0_48 = arith.constant 0 : index
    %c0_49 = arith.constant 0 : index
    %49 = vector.load %arg2[%c8, %c0_48, %c0_49] : memref<9x16x8xbf16, #tpu.memory_space<vmem>>, vector<1x16x8xbf16>
    %50 = vector.shape_cast %49 : vector<1x16x8xbf16> to vector<16x8xbf16>
    %c8_50 = arith.constant 8 : index
    %c0_51 = arith.constant 0 : index
    %c0_52 = arith.constant 0 : index
    %51 = vector.load %arg1[%c8_50, %c0_51, %c0_52] : memref<9x8x256xbf16, #tpu.memory_space<vmem>>, vector<1x8x256xbf16>
    %52 = vector.shape_cast %51 : vector<1x8x256xbf16> to vector<8x256xbf16>
    %cst_53 = arith.constant dense<0.000000e+00> : vector<16x256xf32>
    %53 = tpu.matmul %50, %52, %cst_53 {dimension_numbers = #tpu.dot_dimension_numbers<[1], [0], [0], [1], [0, 0, 1, 1], [], []>} : vector<16x8xbf16>, vector<8x256xbf16>, vector<16x256xf32> -> vector<16x256xf32>
    %54 = arith.addf %48, %53 : vector<16x256xf32>
    %c0_54 = arith.constant 0 : index
    %c0_55 = arith.constant 0 : index
    %55 = vector.load %arg3[%c0_54, %c0_55] : memref<16x1xf32, #tpu.memory_space<vmem>>, vector<16x1xf32>
    %56 = vector.broadcast %55 : vector<16x1xf32> to vector<16x256xf32>
    %57 = arith.addf %54, %56 : vector<16x256xf32>
    %cst_56 = arith.constant 0.000000e+00 : f32
    %58 = vector.broadcast %cst_56 : f32 to vector<8x256xf32>
    %c0_57 = arith.constant 0 : index
    %c0_58 = arith.constant 0 : index
    %c0_59 = arith.constant 0 : index
    %59 = vector.load %arg1[%c0_57, %c0_58, %c0_59] : memref<9x8x256xbf16, #tpu.memory_space<vmem>>, vector<1x8x256xbf16>
    %60 = vector.shape_cast %59 : vector<1x8x256xbf16> to vector<8x256xbf16>
    %61 = arith.extf %60 : vector<8x256xbf16> to vector<8x256xf32>
    %62 = vector.extract_strided_slice %57 {offsets = [0, 0], sizes = [1, 256], strides = [1, 1]} : vector<16x256xf32> to vector<1x256xf32>
    %63 = vector.broadcast %62 : vector<1x256xf32> to vector<8x256xf32>
    %64 = arith.mulf %61, %63 : vector<8x256xf32>
    %65 = arith.addf %58, %64 : vector<8x256xf32>
    %c1_60 = arith.constant 1 : index
    %c0_61 = arith.constant 0 : index
    %c0_62 = arith.constant 0 : index
    %66 = vector.load %arg1[%c1_60, %c0_61, %c0_62] : memref<9x8x256xbf16, #tpu.memory_space<vmem>>, vector<1x8x256xbf16>
    %67 = vector.shape_cast %66 : vector<1x8x256xbf16> to vector<8x256xbf16>
    %68 = arith.extf %67 : vector<8x256xbf16> to vector<8x256xf32>
    %69 = vector.extract_strided_slice %57 {offsets = [1, 0], sizes = [1, 256], strides = [1, 1]} : vector<16x256xf32> to vector<1x256xf32>
    %70 = vector.broadcast %69 : vector<1x256xf32> to vector<8x256xf32>
    %71 = arith.mulf %68, %70 : vector<8x256xf32>
    %72 = arith.addf %65, %71 : vector<8x256xf32>
    %c2_63 = arith.constant 2 : index
    %c0_64 = arith.constant 0 : index
    %c0_65 = arith.constant 0 : index
    %73 = vector.load %arg1[%c2_63, %c0_64, %c0_65] : memref<9x8x256xbf16, #tpu.memory_space<vmem>>, vector<1x8x256xbf16>
    %74 = vector.shape_cast %73 : vector<1x8x256xbf16> to vector<8x256xbf16>
    %75 = arith.extf %74 : vector<8x256xbf16> to vector<8x256xf32>
    %76 = vector.extract_strided_slice %57 {offsets = [2, 0], sizes = [1, 256], strides = [1, 1]} : vector<16x256xf32> to vector<1x256xf32>
    %77 = vector.broadcast %76 : vector<1x256xf32> to vector<8x256xf32>
    %78 = arith.mulf %75, %77 : vector<8x256xf32>
    %79 = arith.addf %72, %78 : vector<8x256xf32>
    %c3_66 = arith.constant 3 : index
    %c0_67 = arith.constant 0 : index
    %c0_68 = arith.constant 0 : index
    %80 = vector.load %arg1[%c3_66, %c0_67, %c0_68] : memref<9x8x256xbf16, #tpu.memory_space<vmem>>, vector<1x8x256xbf16>
    %81 = vector.shape_cast %80 : vector<1x8x256xbf16> to vector<8x256xbf16>
    %82 = arith.extf %81 : vector<8x256xbf16> to vector<8x256xf32>
    %83 = vector.extract_strided_slice %57 {offsets = [3, 0], sizes = [1, 256], strides = [1, 1]} : vector<16x256xf32> to vector<1x256xf32>
    %84 = vector.broadcast %83 : vector<1x256xf32> to vector<8x256xf32>
    %85 = arith.mulf %82, %84 : vector<8x256xf32>
    %86 = arith.addf %79, %85 : vector<8x256xf32>
    %c4_69 = arith.constant 4 : index
    %c0_70 = arith.constant 0 : index
    %c0_71 = arith.constant 0 : index
    %87 = vector.load %arg1[%c4_69, %c0_70, %c0_71] : memref<9x8x256xbf16, #tpu.memory_space<vmem>>, vector<1x8x256xbf16>
    %88 = vector.shape_cast %87 : vector<1x8x256xbf16> to vector<8x256xbf16>
    %89 = arith.extf %88 : vector<8x256xbf16> to vector<8x256xf32>
    %90 = vector.extract_strided_slice %57 {offsets = [4, 0], sizes = [1, 256], strides = [1, 1]} : vector<16x256xf32> to vector<1x256xf32>
    %91 = vector.broadcast %90 : vector<1x256xf32> to vector<8x256xf32>
    %92 = arith.mulf %89, %91 : vector<8x256xf32>
    %93 = arith.addf %86, %92 : vector<8x256xf32>
    %c5_72 = arith.constant 5 : index
    %c0_73 = arith.constant 0 : index
    %c0_74 = arith.constant 0 : index
    %94 = vector.load %arg1[%c5_72, %c0_73, %c0_74] : memref<9x8x256xbf16, #tpu.memory_space<vmem>>, vector<1x8x256xbf16>
    %95 = vector.shape_cast %94 : vector<1x8x256xbf16> to vector<8x256xbf16>
    %96 = arith.extf %95 : vector<8x256xbf16> to vector<8x256xf32>
    %97 = vector.extract_strided_slice %57 {offsets = [5, 0], sizes = [1, 256], strides = [1, 1]} : vector<16x256xf32> to vector<1x256xf32>
    %98 = vector.broadcast %97 : vector<1x256xf32> to vector<8x256xf32>
    %99 = arith.mulf %96, %98 : vector<8x256xf32>
    %100 = arith.addf %93, %99 : vector<8x256xf32>
    %c6_75 = arith.constant 6 : index
    %c0_76 = arith.constant 0 : index
    %c0_77 = arith.constant 0 : index
    %101 = vector.load %arg1[%c6_75, %c0_76, %c0_77] : memref<9x8x256xbf16, #tpu.memory_space<vmem>>, vector<1x8x256xbf16>
    %102 = vector.shape_cast %101 : vector<1x8x256xbf16> to vector<8x256xbf16>
    %103 = arith.extf %102 : vector<8x256xbf16> to vector<8x256xf32>
    %104 = vector.extract_strided_slice %57 {offsets = [6, 0], sizes = [1, 256], strides = [1, 1]} : vector<16x256xf32> to vector<1x256xf32>
    %105 = vector.broadcast %104 : vector<1x256xf32> to vector<8x256xf32>
    %106 = arith.mulf %103, %105 : vector<8x256xf32>
    %107 = arith.addf %100, %106 : vector<8x256xf32>
    %c7_78 = arith.constant 7 : index
    %c0_79 = arith.constant 0 : index
    %c0_80 = arith.constant 0 : index
    %108 = vector.load %arg1[%c7_78, %c0_79, %c0_80] : memref<9x8x256xbf16, #tpu.memory_space<vmem>>, vector<1x8x256xbf16>
    %109 = vector.shape_cast %108 : vector<1x8x256xbf16> to vector<8x256xbf16>
    %110 = arith.extf %109 : vector<8x256xbf16> to vector<8x256xf32>
    %111 = vector.extract_strided_slice %57 {offsets = [7, 0], sizes = [1, 256], strides = [1, 1]} : vector<16x256xf32> to vector<1x256xf32>
    %112 = vector.broadcast %111 : vector<1x256xf32> to vector<8x256xf32>
    %113 = arith.mulf %110, %112 : vector<8x256xf32>
    %114 = arith.addf %107, %113 : vector<8x256xf32>
    %c8_81 = arith.constant 8 : index
    %c0_82 = arith.constant 0 : index
    %c0_83 = arith.constant 0 : index
    %115 = vector.load %arg1[%c8_81, %c0_82, %c0_83] : memref<9x8x256xbf16, #tpu.memory_space<vmem>>, vector<1x8x256xbf16>
    %116 = vector.shape_cast %115 : vector<1x8x256xbf16> to vector<8x256xbf16>
    %117 = arith.extf %116 : vector<8x256xbf16> to vector<8x256xf32>
    %118 = vector.extract_strided_slice %57 {offsets = [8, 0], sizes = [1, 256], strides = [1, 1]} : vector<16x256xf32> to vector<1x256xf32>
    %119 = vector.broadcast %118 : vector<1x256xf32> to vector<8x256xf32>
    %120 = arith.mulf %117, %119 : vector<8x256xf32>
    %121 = arith.addf %114, %120 : vector<8x256xf32>
    %c0_84 = arith.constant 0 : index
    %c0_85 = arith.constant 0 : index
    %122 = vector.load %arg4[%c0_84, %c0_85] : memref<16x8xbf16, #tpu.memory_space<vmem>>, vector<16x8xbf16>
    %123 = arith.truncf %121 : vector<8x256xf32> to vector<8x256xbf16>
    %cst_86 = arith.constant dense<0.000000e+00> : vector<16x256xf32>
    %124 = tpu.matmul %122, %123, %cst_86 {dimension_numbers = #tpu.dot_dimension_numbers<[1], [0], [0], [1], [0, 0, 1, 1], [], []>} : vector<16x8xbf16>, vector<8x256xbf16>, vector<16x256xf32> -> vector<16x256xf32>
    %c0_87 = arith.constant 0 : index
    %c0_88 = arith.constant 0 : index
    %125 = vector.load %arg5[%c0_87, %c0_88] : memref<16x1xf32, #tpu.memory_space<vmem>>, vector<16x1xf32>
    %126 = vector.broadcast %125 : vector<16x1xf32> to vector<16x256xf32>
    %127 = arith.addf %124, %126 : vector<16x256xf32>
    %c0_89 = arith.constant 0 : index
    %c0_90 = arith.constant 0 : index
    %128 = vector.load %arg6[%c0_89, %c0_90] : memref<16x256xf32, #tpu.memory_space<vmem>>, vector<16x256xf32>
    tpu.vector_store %arg6[%c0_89, %c0_90], %127 {strides = array<i32>} : memref<16x256xf32, #tpu.memory_space<vmem>>, vector<16x256xf32>,
    return
  }
  func.func @transform_0(%arg0: i32) -> (i32, i32, i32) {
    %c0_i32 = arith.constant 0 : i32
    %c0_i32_0 = arith.constant 0 : i32
    %c0_i32_1 = arith.constant 0 : i32
    return %c0_i32, %c0_i32_0, %arg0 : i32, i32, i32
  }
  func.func @transform_1(%arg0: i32) -> (i32, i32, i32) {
    %c0_i32 = arith.constant 0 : i32
    %c0_i32_0 = arith.constant 0 : i32
    %c0_i32_1 = arith.constant 0 : i32
    %c0_i32_2 = arith.constant 0 : i32
    return %c0_i32, %c0_i32_0, %c0_i32_1 : i32, i32, i32
  }
  func.func @transform_2(%arg0: i32) -> (i32, i32) {
    %c0_i32 = arith.constant 0 : i32
    %c0_i32_0 = arith.constant 0 : i32
    %c0_i32_1 = arith.constant 0 : i32
    return %c0_i32, %c0_i32_0 : i32, i32
  }
  func.func @transform_3(%arg0: i32) -> (i32, i32) {
    %c0_i32 = arith.constant 0 : i32
    %c0_i32_0 = arith.constant 0 : i32
    %c0_i32_1 = arith.constant 0 : i32
    return %c0_i32, %c0_i32_0 : i32, i32
  }
  func.func @transform_4(%arg0: i32) -> (i32, i32) {
    %c0_i32 = arith.constant 0 : i32
    %c0_i32_0 = arith.constant 0 : i32
    %c0_i32_1 = arith.constant 0 : i32
    return %c0_i32, %c0_i32_0 : i32, i32
  }
  func.func @transform_5(%arg0: i32) -> (i32, i32) {
    %c0_i32 = arith.constant 0 : i32
    %c0_i32_0 = arith.constant 0 : i32
    return %c0_i32, %arg0 : i32, i32
  }
}

</mosaic_0001>

<bundles_post_ra>
// kernel: tpu_custom_call.1
= control target key start
LH: loop header
LB: loop body
LE: loop exit
PB: predicated region body
PF: predicated region fallthrough
CT: control target
= control target key end

     0   :  { %10 = vsyncpa [#allocation4], 0  ;;  %s1822_s0 = inlined_call_operand.vmem [shape: bf16[9,8,512], index: 0, kind: input, shape index: {}]   ;;  %s1823_s1 = inlined_call_operand.vmem [shape: bf16[9,16,8], index: 1, kind: input, shape index: {}]   ;;  %s1824_s2 = inlined_call_operand.vmem [shape: f32[16,1], index: 2, kind: input, shape index: {}]   ;;  %s1825_s3 = inlined_call_operand.vmem [shape: bf16[16,8], index: 3, kind: input, shape index: {}]   ;;  %s1826_s4 = inlined_call_operand.vmem [shape: f32[16,1], index: 4, kind: input, shape index: {}]   ;;  %s1827_s5 = inlined_call_operand.hbm [shape: f32[16,512], index: 5, kind: output, shape index: {}]  }
   0x1   :  { %12 = vsyncpa [#allocation4 + $0x1], 0  ;;  %s1517_s18 = smov 0   ;;  %s1519_s19 = smov 0  }
   0x2   :  { %s1521_s20 = smov 0   ;;  %s1523_s21 = smov 0  }
   0x3 LB: > { %s1224_s22 = sadd.s32 4294967295, %s1480_s21   ;;  %s1225_s23 = sadd.s32 4294967294, %s1480_s21   ;;  %s1480_s21 = sphi %s1523_s21, %s1833_s21   ;;  %s1476_s20 = sphi %s1521_s20, %s1832_s20   ;;  %s1472_s19 = sphi %s1519_s19, %s1831_s19   ;;  %s1468_s18 = sphi %s1517_s18, %s1830_s18  }
   0x4   : > { %s1540_s24 = sadd.s32 1, %s1480_s21   ;;  %s25_s25 = sadd.s32 1, %s1476_s20 }
   0x5   : > { %s22_s26 = ssub.s32 %s1480_s21, %s1540_s24  ;;  %p32_p0 = scmp.ne.s32.totalorder %s1476_s20, %s1472_s19 }
   0x6   : > { %p23_p1 = scmp.eq.s32.totalorder %s22_s26, 0  ;;  %p33_p2 = scmp.eq.s32.totalorder %s1480_s21, 0 }
   0x7   : > { %p146_p3 = scmp.eq.s32.totalorder %s1224_s22, 1  ;;  %p151_p4 = scmp.ne.s32.totalorder %s1472_s19, %s1468_s18 }
   0x8   : > { %s1553_s27 = scalar_select %p23_p1, %s1476_s20, %s25_s25  }
   0x9   : > { %p34_p5 = por %p33_p2, %p32_p0  ;;  %p1555_p6 = por %p146_p3, %p32_p0 }
   0xa   : > { %p152_p7 = scmp.eq.s32.totalorder %s1225_s23, 1  ;;  %p1227_p9 = scmp.ge.s32.totalorder %s1480_s21, 2 }
   0xc   : > { %p1559_p8 = por %p152_p7, %p151_p4  ;;  %180 = sbr.rel (%p1227_p9) target bundleno = 28 (0x1c), region = 32 }
  0x13   : > { %183 = sbr.rel (!%p34_p5) target bundleno = 28 (0x1c), region = 36  ;;  %s185_s30 = sand.u32 (%p34_p5), 1, %s1476_s20  }
  0x14   : > { %s1309_s6 = sshll.u32 (%p34_p5), %s1480_s21, 3  ;;  %s1343_s7 = smul.u32 (%p34_p5), 72, %s185_s30 }
  0x15   : > { %s190_s10 = scalar_lea.vmem (%p34_p5), %s1822_s0, %s1309_s6 }
  0x16   : > { %v234_v0 = vld [vmem:[%s190_s10] sm:$0xff] (%p34_p5)  ;;  %v236_v1 = vld [vmem:[%s190_s10 + $0x10] sm:$0xff] (%p34_p5)  ;;  %s187_s11 = scalar_lea.vmem (%p34_p5), [#allocation2], %s1343_s7 }
  0x17   : > { %v238_v2 = vld [vmem:[%s190_s10 + $0x20] sm:$0xff] (%p34_p5)  ;;  %v240_v3 = vld [vmem:[%s190_s10 + $0x30] sm:$0xff] (%p34_p5)  ;;  %235 = vst [vmem:[%s187_s11] sm:$0xff] (%p34_p5), %v234_v0  ;;  %237 = vst [vmem:[%s187_s11 + $0x8] sm:$0xff] (%p34_p5), %v236_v1 }
  0x18   : > { %v242_v4 = vld [vmem:[%s190_s10 + $0x40] sm:$0xff] (%p34_p5)  ;;  %v244_v5 = vld [vmem:[%s190_s10 + $0x50] sm:$0xff] (%p34_p5)  ;;  %239 = vst [vmem:[%s187_s11 + $0x10] sm:$0xff] (%p34_p5), %v238_v2  ;;  %241 = vst [vmem:[%s187_s11 + $0x18] sm:$0xff] (%p34_p5), %v240_v3 }
  0x19   : > { %243 = vst [vmem:[%s187_s11 + $0x20] sm:$0xff] (%p34_p5), %v242_v4  ;;  %245 = vst [vmem:[%s187_s11 + $0x28] sm:$0xff] (%p34_p5), %v244_v5  ;;  %v246_v6 = vld [vmem:[%s190_s10 + $0x60] sm:$0xff] (%p34_p5)  ;;  %v248_v7 = vld [vmem:[%s190_s10 + $0x70] sm:$0xff] (%p34_p5) }
  0x1a   : > { %v250_v8 = vld [vmem:[%s190_s10 + $0x80] sm:$0xff]  ;;  %247 = vst [vmem:[%s187_s11 + $0x30] sm:$0xff] %v246_v6  ;;  %249 = vst [vmem:[%s187_s11 + $0x38] sm:$0xff] %v248_v7 }
  0x1b   : > { %251 = vst [vmem:[%s187_s11 + $0x40] sm:$0xff] %v250_v8 }
  0x1c PF: > { %p1230_p10 = scmp.ge.s32.totalorder %s1480_s21, 1  ;;  %p256_p11 = scmp.lt.s32.totalorder %s1480_s21, 3 }
  0x1e   : > { %p257_p12 = pnand %p1230_p10, %p256_p11 }
  0x1f   : > { %s1574_s12 = sand.u32 (!%p257_p12), 1, %s1472_s19   ;;  %v1482_v9 = vmov (!%p257_p12), 0   ;;  %vm315_vm0 = vcmask (!%p257_p12), 1043456   ;;  %v1394_v18 = vld [vmem:[%s1823_s1 + $0x8] sm:$0xff] (!%p257_p12)   ;;  %v1395_v19 = vld [vmem:[%s1823_s1 + $0x20] sm:$0xff] (!%p257_p12)   ;;  %vm311_vm1 = vcmask (!%p257_p12), 64512   ;;  %v942_v63 = vlaneseq (!%p257_p12) }
  0x20   : > { %260 = sbr.rel (%p257_p12) target bundleno = 567 (0x237), region = 74  ;;  %354 = vmatprep.mubr.bf16.mxu1 (!%p257_p12), %v1482_v9  ;;  %625 = vmatprep.mubr.bf16.mxu0 (!%p257_p12), %v1482_v9  ;;  %v924_v32 = vld [vmem:[%s1824_s2] sm:$0xff] (!%p257_p12)  ;;  %v925_v33 = vld [vmem:[%s1824_s2 + $0x8] sm:$0xff] (!%p257_p12)  ;;  %v1406_v46 = vld [vmem:[%s1823_s1 + $0x10] sm:$0xff] (!%p257_p12)   ;;  %s1483_s30 = smov (!%p257_p12), [#allocation3]  }
  0x21   : > { %s1344_s13 = smul.u32 (!%p257_p12), 72, %s1574_s12  ;;  %1388 = vset.pattern.permute.xlu0 (!%p257_p12), %v1482_v9  ;;  %1389 = vset.pattern.permute.xlu1 (!%p257_p12), %v1482_v9  ;;  %v1400_v36 = vld [vmem:[%s1823_s1] sm:$0xff] (!%p257_p12)   ;;  %v1401_v37 = vld [vmem:[%s1823_s1 + $0x28] sm:$0xff] (!%p257_p12)   ;;  %v1407_v47 = vld [vmem:[%s1823_s1 + $0x30] sm:$0xff] (!%p257_p12)   ;;  %v1720_v0 = vshrl.u32 (!%p257_p12), %v942_v63, 7  ;;  %s1422_s6 = sshll.u32 (!%p257_p12), %s1483_s30, 4  ;;  %s1423_s6 = int_to_ptr.vmem [resolvable:$false] %s1422_s6 }
  0x22   : > { %928 = vperm.xlu0 (!%p257_p12), %1388, %v924_v32   ;;  %v1412_v53 = vld [vmem:[%s1823_s1 + $0x18] sm:$0xff] (!%p257_p12)   ;;  %v1416_v56 = vld [vmem:[%s1823_s1 + $0x40] sm:$0xff] (!%p257_p12)   ;;  %v1071_v58 = vld [vmem:[%s1826_s4 + $0x8] sm:$0xff] (!%p257_p12)  ;;  %s1424_s7 = scalar_lea.vmem (!%p257_p12), %s1423_s6, 1024 }
  0x23   : > { %s1581_s14 = scalar_lea.vmem (!%p257_p12), [#allocation2], %s1344_s13  ;;  %v1413_v54 = vld [vmem:[%s1823_s1 + $0x38] sm:$0xff] (!%p257_p12)   ;;  %v1070_v57 = vld [vmem:[%s1826_s4] sm:$0xff] (!%p257_p12)  ;;  %v1727_v8 = vsub.s32 (!%p257_p12), 0, %v1720_v0  ;;  %v1014_v32 = vsub.s32 (!%p257_p12), 5, %v1720_v0  ;;  %s1231_s13 = sshll.u32 (!%p257_p12), %s1574_s12, 5 }
  0x24   : > { %v1584_v10 = vld [vmem:[%s1581_s14 + $0x8] sm:$0xff] (!%p257_p12)  ;;  %v1587_v11 = vld [vmem:[%s1581_s14 + $0x20] sm:$0xff] (!%p257_p12)  ;;  %v1620_v25 = vld [vmem:[%s1581_s14 + $0x30] sm:$0xff] (!%p257_p12)  ;;  %1074 = vperm.xlu1 (!%p257_p12), %1389, %v1070_v57   ;;  %s289_s15 = scalar_lea.vmem (!%p257_p12), [#allocation3], %s1231_s13 }
  0x25   : > { %v1590_v12 = vld [vmem:[%s1581_s14 + $0x28] sm:$0xff] (!%p257_p12)  ;;  %v1237_v13 = vcombine.high (!%p257_p12), %v1584_v10, %v1584_v10  ;;  %v1266_v14 = vcombine.high (!%p257_p12), %v1587_v11, %v1587_v11  ;;  %v1597_v15 = vld [vmem:[%s1581_s14] sm:$0xff] (!%p257_p12)  ;;  %v1236_v16 = vcombine.low (!%p257_p12), %v1584_v10, %v1584_v10  ;;  %v1265_v17 = vcombine.low (!%p257_p12), %v1587_v11, %v1587_v11  ;;  %v1623_v26 = vld [vmem:[%s1581_s14 + $0x10] sm:$0xff] (!%p257_p12)  ;;  %s1157_s16 = sshll.u32 (!%p257_p12), %s289_s15, 4  ;;  %s1773_s16 = int_to_ptr.vmem [resolvable:$true] %s1157_s16 }
  0x26   : > { %v1274_v20 = vcombine.high (!%p257_p12), %v1590_v12, %v1590_v12  ;;  %v1273_v21 = vcombine.low (!%p257_p12), %v1590_v12, %v1590_v12  ;;  %v1242_v24 = vcombine.high (!%p257_p12), %v1597_v15, %v1597_v15  ;;  %v1241_v27 = vcombine.low (!%p257_p12), %v1597_v15, %v1597_v15  ;;  %v1658_v38 = vld [vmem:[%s1581_s14 + $0x38] sm:$0xff] (!%p257_p12)  ;;  %933 = vperm.xlu0 (!%p257_p12), %1388, %v925_v33   ;;  %v1686_v48 = vld [vmem:[%s1581_s14 + $0x40] sm:$0xff] (!%p257_p12)  ;;  %s1418_s26 = scalar_lea.vmem (!%p257_p12), %s1773_s16, 512  ;;  %p1425_p2 = scmp.lt.s32.totalorder (!%p257_p12), %s1773_s16, %s1423_s6 }
  0x27   : > { %1238 = vmatprep.subr.msk.bf16.mxu1 %vm315_vm0, %v1237_v13  ;;  %1267 = vmatprep.subr.msk.bf16.mxu0 %vm315_vm0, %v1266_v14  ;;  %v317_v22 = vsel %vm315_vm0, %v1236_v16, 0  ;;  %v588_v23 = vsel %vm315_vm0, %v1265_v17, 0  ;;  %v1282_v30 = vcombine.high %v1620_v25, %v1620_v25  ;;  %v1250_v31 = vcombine.high %v1623_v26, %v1623_v26  ;;  %v1661_v39 = vld [vmem:[%s1581_s14 + $0x18] sm:$0xff]  ;;  %s1310_s14 = sshll.u32 %s1224_s22, 8  ;;  %s1144_s22 = scalar_lea.sflag [#allocation4], %s1574_s12 }
  0x28   : > { %323 = vmatpush1.bf16.msra.mxu1 %v317_v22  ;;  %594 = vmatpush1.bf16.msra.mxu0 %v588_v23  ;;  %v659_v28 = vsel %vm315_vm0, %v1273_v21, 0  ;;  %v379_v29 = vsel %vm315_vm0, %v1241_v27, 0  ;;  %v1281_v34 = vcombine.low %v1620_v25, %v1620_v25  ;;  %v1249_v35 = vcombine.low %v1623_v26, %v1623_v26  ;;  %s1778_s25 = scalar_lea.hbm %s1827_s5, %s1310_s14  ;;  %p1419_p13 = scmp.ne.s32.totalorder %s1773_s16, %s1418_s26 }
  0x29   : > { %1275 = vmatprep.subr.msk.bf16.mxu0 %vm315_vm0, %v1274_v20  ;;  %1243 = vmatprep.subr.msk.bf16.mxu1 %vm315_vm0, %v1242_v24  ;;  %v1290_v42 = vcombine.high %v1658_v38, %v1658_v38  ;;  %v1258_v43 = vcombine.high %v1661_v39, %v1661_v39  ;;  %v1289_v44 = vcombine.low %v1658_v38, %v1658_v38  ;;  %v954_v1 = vunpack.c.l.bf16 %v1584_v10  ;;  %p1426_p3 = scmp.lt.s32.totalorder %s1424_s7, %s1418_s26 }
  0x2a   : > { %v730_v40 = vsel %vm315_vm0, %v1281_v34, 0  ;;  %v446_v41 = vsel %vm315_vm0, %v1249_v35, 0  ;;  %v1257_v45 = vcombine.low %v1661_v39, %v1661_v39  ;;  %v1298_v51 = vcombine.high %v1686_v48, %v1686_v48  ;;  %1079 = vperm.xlu1 %1389, %v1071_v58   ;;  %p1420_p0 = pnand %p1419_p13, %p1555_p6 }
  0x2b   : > { %1239 = vmatmul.mubr.msk.bf16.vlgmr.msra.gmra.mrb[0].mxu1 %vm311_vm1, %v1394_v18  ;;  %1268 = vmatmul.mubr.msk.bf16.vlgmr.msra.gmra.mrb[0].mxu0 %vm311_vm1, %v1395_v19  ;;  %v801_v49 = vsel %vm315_vm0, %v1289_v44, 0  ;;  %v1297_v52 = vcombine.low %v1686_v48, %v1686_v48  ;;  %v955_v2 = vunpack.c.h.bf16 %v1584_v10  ;;  %v997_v4 = vunpack.c.h.bf16 %v1587_v11  ;;  %p1427_p4 = por %p1426_p3, %p1425_p2 }
  0x2c   : > { %665 = vmatpush1.bf16.msra.mxu0 %v659_v28  ;;  %385 = vmatpush1.bf16.msra.mxu1 %v379_v29  ;;  %v517_v50 = vsel %vm315_vm0, %v1257_v45, 0  ;;  %v1011_v5 = vunpack.c.h.bf16 %v1590_v12  ;;  %v958_v17 = vsub.s32 1, %v1720_v0  ;;  %v972_v18 = vsub.s32 2, %v1720_v0  ;;  %p1421_p1 = pneg %p1420_p0 }
  0x2d   : > { %416 = vmatprep.mubr.bf16.mxu1 %v1482_v9  ;;  %696 = vmatprep.mubr.bf16.mxu0 %v1482_v9  ;;  %v872_v55 = vsel %vm315_vm0, %v1297_v52, 0  ;;  %v986_v21 = vsub.s32 3, %v1720_v0  ;;  %v1000_v22 = vsub.s32 4, %v1720_v0  ;;  %v941_v23 = vunpack.c.h.bf16 %v1597_v15 }
  0x2e   : > { %1283 = vmatprep.subr.msk.bf16.mxu0 %vm315_vm0, %v1282_v30  ;;  %1251 = vmatprep.subr.msk.bf16.mxu1 %vm315_vm0, %v1250_v31  ;;  %v969_v24 = vunpack.c.h.bf16 %v1623_v26  ;;  %v968_v29 = vunpack.c.l.bf16 %v1623_v26  ;;  %v983_v30 = vunpack.c.h.bf16 %v1661_v39  ;;  %v982_v44 = vunpack.c.l.bf16 %v1661_v39  ;;  %p1428_p5 = pnand %p1427_p4, %p1421_p1 }
  0x2f   : > { %v1028_v52 = vsub.s32 6, %v1720_v0  ;;  %v1042_v58 = vsub.s32 7, %v1720_v0 }
  0x37   : > { %1244 = vmatmul.mubr.msk.bf16.vlgmr.msra.gmra.mrb[0].mxu1 %vm311_vm1, %v1400_v36  ;;  %1276 = vmatmul.mubr.msk.bf16.vlgmr.msra.gmra.mrb[0].mxu0 %vm311_vm1, %v1401_v37 }
  0x38   : > { %736 = vmatpush1.bf16.msra.mxu0 %v730_v40  ;;  %452 = vmatpush1.bf16.msra.mxu1 %v446_v41 }
  0x39   : > { %483 = vmatprep.mubr.bf16.mxu1 %v1482_v9  ;;  %767 = vmatprep.mubr.bf16.mxu0 %v1482_v9 }
  0x3a   : > { %1291 = vmatprep.subr.msk.bf16.mxu0 %vm315_vm0, %v1290_v42  ;;  %1259 = vmatprep.subr.msk.bf16.mxu1 %vm315_vm0, %v1258_v43 }
  0x43   : > { %1252 = vmatmul.mubr.msk.bf16.vlgmr.msra.gmra.mrb[0].mxu1 %vm311_vm1, %v1406_v46  ;;  %1284 = vmatmul.mubr.msk.bf16.vlgmr.msra.gmra.mrb[0].mxu0 %vm311_vm1, %v1407_v47 }
  0x44   : > { %807 = vmatpush1.bf16.msra.mxu0 %v801_v49  ;;  %523 = vmatpush1.bf16.msra.mxu1 %v517_v50  ;;  %v996_v49 = vunpack.c.l.bf16 %v1587_v11  ;;  %v1010_v50 = vunpack.c.l.bf16 %v1590_v12 }
  0x45   : > { %554 = vmatprep.mubr.bf16.mxu1 %v1482_v9  ;;  %838 = vmatprep.mubr.bf16.mxu0 %v1482_v9 }
  0x46   : > { %1299 = vmatprep.subr.msk.bf16.mxu0 %vm315_vm0, %v1298_v51 }
  0x4f   : > { %1260 = vmatmul.mubr.msk.bf16.vlgmr.msra.gmra.mrb[0].mxu1 %vm311_vm1, %v1412_v53  ;;  %1292 = vmatmul.mubr.msk.bf16.vlgmr.msra.gmra.mrb[0].mxu0 %vm311_vm1, %v1413_v54 }
  0x50   : > { %878 = vmatpush1.bf16.msra.mxu0 %v872_v55  ;;  %909 = vmatprep.mubr.bf16.mxu0 %v1482_v9 }
  0x51   : > { %1128 = vmatprep.mubr.bf16.mxu1 %v1482_v9  ;;  %v940_v9 = vunpack.c.l.bf16 %v1597_v15 }
  0x5b   : > { %1300 = vmatmul.mubr.msk.bf16.vlgmr.msra.gmra.mrb[0].mxu0 %vm311_vm1, %v1416_v56 }
  0xa1   : > { %v929_v13 = vpop.permute.xlu0 %928 }
 0x122   : > { %v556_v59 = vpop.f32.mrb[0].mxu1 }
 0x123   : > { %v558_v60 = vpop.f32.mrb[1].mxu1 }
 0x124   : > { %v560_v61 = vpop.f32.mrb[2].mxu1 }
 0x125   : > { %v562_v62 = vpop.f32.mrb[3].mxu1 }
 0x12e   : > { %v911_v3 = vpop.f32.mrb[0].mxu0 }
 0x12f   : > { %v1311_v6 = vadd.f32 %v911_v3, %v556_v59  ;;  %v913_v7 = vpop.f32.mrb[1].mxu0  ;;  %v1025_v59 = vunpack.c.h.bf16 %v1620_v25 }
 0x130   : > { %v1312_v14 = vadd.f32 %v913_v7, %v558_v60  ;;  %v915_v16 = vpop.f32.mrb[2].mxu0  ;;  %v934_v60 = vpop.permute.xlu0 %933 }
 0x131   : > { %v1732_v10 = vadd.f32 %v1311_v6, %v929_v13  ;;  %v1313_v19 = vadd.f32 %v915_v16, %v560_v61  ;;  %v917_v20 = vpop.f32.mrb[3].mxu0  ;;  %v1039_v6 = vunpack.c.h.bf16 %v1658_v38  ;;  %v1053_v16 = vunpack.c.h.bf16 %v1686_v48 }
 0x132   : > { %v937_v27 = vadd.f32 %v1312_v14, %v929_v13  ;;  %v1314_v28 = vadd.f32 %v917_v20, %v562_v62  ;;  %v1024_v13 = vunpack.c.l.bf16 %v1620_v25 }
 0x133   : > { %v945_v31 = vrot.slane %v1732_v10, %v1727_v8  ;;  %v959_v36 = vrot.slane %v1732_v10, %v958_v17  ;;  %v973_v41 = vrot.slane %v1732_v10, %v972_v18  ;;  %v987_v56 = vrot.slane %v1732_v10, %v986_v21 }
 0x134   : > { %v949_v33 = vrot.slane %v937_v27, %v1727_v8  ;;  %v963_v34 = vrot.slane %v937_v27, %v958_v17  ;;  %v977_v35 = vrot.slane %v937_v27, %v972_v18  ;;  %v991_v37 = vrot.slane %v937_v27, %v986_v21 }
 0x135   : > { %v950_v15 = vmul.f32 %v945_v31, %v940_v9  ;;  %v1005_v40 = vrot.slane %v937_v27, %v1000_v22  ;;  %v1019_v47 = vrot.slane %v937_v27, %v1014_v32  ;;  %v964_v54 = vmul.f32 %v959_v36, %v954_v1 }
 0x136   : > { %v951_v42 = vmul.f32 %v949_v33, %v941_v23  ;;  %v965_v26 = vmul.f32 %v963_v34, %v955_v2  ;;  %v979_v43 = vmul.f32 %v977_v35, %v969_v24  ;;  %v993_v45 = vmul.f32 %v991_v37, %v983_v30  ;;  %v1075_v37 = vpop.permute.xlu1 %1074 }
 0x137   : > { %v1007_v46 = vmul.f32 %v1005_v40, %v997_v4  ;;  %v1021_v53 = vmul.f32 %v1019_v47, %v1011_v5  ;;  %v978_v55 = vmul.f32 %v973_v41, %v968_v29  ;;  %v1001_v39 = vrot.slane %v1732_v10, %v1000_v22 }
 0x138   : > { %v967_v51 = vadd.f32 %v965_v26, %v951_v42  ;;  %v966_v61 = vadd.f32 %v964_v54, %v950_v15  ;;  %v992_v11 = vmul.f32 %v987_v56, %v982_v44  ;;  %v1015_v12 = vrot.slane %v1732_v10, %v1014_v32 }
 0x139   : > { %v939_v62 = vadd.f32 %v1314_v28, %v934_v60  ;;  %v1033_v2 = vrot.slane %v937_v27, %v1028_v52  ;;  %v1006_v3 = vmul.f32 %v1001_v39, %v996_v49  ;;  %v1047_v7 = vrot.slane %v937_v27, %v1042_v58 }
 0x13a   : > { %v981_v57 = vadd.f32 %v979_v43, %v967_v51  ;;  %v980_v1 = vadd.f32 %v978_v55, %v966_v61  ;;  %v1020_v4 = vmul.f32 %v1015_v12, %v1010_v50  ;;  %v938_v0 = vadd.f32 %v1313_v19, %v934_v60  ;;  %v1080_v44 = vpop.permute.xlu1 %1079 }
 0x13b   : > { %v1029_v14 = vrot.slane %v1732_v10, %v1028_v52  ;;  %v1061_v17 = vrot.slane %v939_v62, %v1727_v8  ;;  %v1035_v20 = vmul.f32 %v1033_v2, %v1025_v59  ;;  %v1038_v22 = vunpack.c.l.bf16 %v1658_v38 }
 0x13c   : > { %v995_v63 = vadd.f32 %v993_v45, %v981_v57  ;;  %v994_v9 = vadd.f32 %v992_v11, %v980_v1  ;;  %v1043_v23 = vrot.slane %v1732_v10, %v1042_v58  ;;  %v1049_v28 = vmul.f32 %v1047_v7, %v1039_v6 }
 0x13d   : > { %v1052_v19 = vunpack.c.l.bf16 %v1686_v48  ;;  %v1057_v27 = vrot.slane %v938_v0, %v1727_v8  ;;  %v1034_v29 = vmul.f32 %v1029_v14, %v1024_v13  ;;  %v1063_v30 = vmul.f32 %v1061_v17, %v1053_v16  ;;  %v1417_v8 = vld [vmem:[%s1825_s3] sm:$0xff]  }
 0x13e   : > { %v1009_v5 = vadd.f32 %v1007_v46, %v995_v63  ;;  %v1008_v21 = vadd.f32 %v1006_v3, %v994_v9  ;;  %v1048_v33 = vmul.f32 %v1043_v23, %v1038_v22 }
 0x13f   : > { %v1062_v35 = vmul.f32 %v1057_v27, %v1052_v19 }
 0x140   : > { %v1023_v18 = vadd.f32 %v1021_v53, %v1009_v5  ;;  %v1022_v25 = vadd.f32 %v1020_v4, %v1008_v21 }
 0x142   : > { %v1037_v24 = vadd.f32 %v1035_v20, %v1023_v18  ;;  %v1036_v32 = vadd.f32 %v1034_v29, %v1022_v25 }
 0x144   : > { %v1051_v31 = vadd.f32 %v1049_v28, %v1037_v24  ;;  %v1050_v36 = vadd.f32 %v1048_v33, %v1036_v32 }
 0x146   : > { %v1065_v34 = vadd.f32 %v1063_v30, %v1051_v31  ;;  %v1064_v15 = vadd.f32 %v1062_v35, %v1050_v36 }
 0x148   : > { %v1069_v38 = vpack.c.bf16 %v1065_v34, %v1065_v34  ;;  %v1068_v10 = vpack.c.bf16 %v1064_v15, %v1064_v15 }
 0x14a   : > { %1302 = vmatprep.subr.msk.bf16.mxu1 %vm315_vm0, %v1069_v38  ;;  %v1091_v48 = vsel %vm315_vm0, %v1068_v10, 0 }
 0x14b   : > { %1097 = vmatpush1.bf16.msra.mxu1 %v1091_v48 }
 0x14e   : > { %1303 = vmatmul.mubr.msk.bf16.vlgmr.msra.gmra.mrb[4].mxu1 %vm311_vm1, %v1417_v8 }
 0x221   : > { %v1130_v40 = vpop.f32.mrb[4].mxu1 }
 0x222   : > { %v1131_v41 = vadd.f32 %v1130_v40, %v1075_v37  ;;  %v1132_v42 = vpop.f32.mrb[5].mxu1 }
 0x223   : > { %v1133_v26 = vadd.f32 %v1132_v42, %v1075_v37  ;;  %v1134_v43 = vpop.f32.mrb[6].mxu1 }
 0x224   : > { %1139 = vst [vmem:[%s289_s15] sm:$0xff] %v1131_v41  ;;  %v1135_v45 = vadd.f32 %v1134_v43, %v1080_v44  ;;  %v1136_v46 = vpop.f32.mrb[7].mxu1 }
 0x225   : > { %1140 = vst [vmem:[%s289_s15 + $0x8] sm:$0xff] %v1133_v26  ;;  %v1137_v47 = vadd.f32 %v1136_v46, %v1080_v44 }
 0x226   : > { %1141 = vst [vmem:[%s289_s15 + $0x10] sm:$0xff] %v1135_v45 }
 0x227   : > { %1142 = vst [vmem:[%s289_s15 + $0x18] sm:$0xff] %v1137_v47 }
 0x228   : > { %1431 = shalt.err (!%p1428_p5)
}
 0x229   : > { %s1432_s8 = scalar_lea.hbm %s1778_s25, 512  ;;  %s1436_s11 = scalar_lea.hbm %s1827_s5, 1024 }
 0x22a   : > { %p1433_p7 = scmp.ne.s32.totalorder %s1778_s25, %s1432_s8  ;;  %p1437_p12 = scmp.lt.u32.totalorder %s1778_s25, %s1827_s5 }
 0x22b   : > { %p1438_p13 = scmp.lt.u32.totalorder %s1436_s11, %s1432_s8  ;;  %p1440_p1 = scmp.lt.u32.totalorder %s1432_s8, %s1778_s25 }
 0x22c   : > { %p1434_p10 = pnand %p1433_p7, %p1555_p6 }
 0x22d   : > { %p1439_p0 = por %p1438_p13, %p1437_p12 }
 0x22e   : > { %p1435_p11 = pneg %p1434_p10 }
 0x22f   : > { %p1441_p2 = por %p1440_p1, %p1439_p0 }
 0x231   : > { %p1442_p3 = pnand %p1441_p2, %p1435_p11 }
 0x233   : > { %1445 = shalt.err (!%p1442_p3)
}
 0x234   : > { %s1484_s14 = smov 256   ;;  %s1485_s17 = smov 512  }
 0x235   : > { %s1486_s23 = smov 16  }
 0x236   : > { %1345 = dma.vmem_to_hbm [thread:$0]  (%p1555_p6), %s1773_s16, 512, %s1778_s25, %s1144_s22, %s1484_s14, %s1485_s17, %s1486_s23  }
 0x237 PF: > { %s1172_s26 = sand.u32 1, %s1468_s18   ;;  %p1348_p4 = pnand %p1227_p9, %p1559_p8 }
 0x238   : > { %s1173_s30 = scalar_lea.sflag [#allocation4], %s1172_s26 }
 0x239   : > { %1463 = dma.done.wait (!%p1348_p4), %s1173_s30, 512  }
 0x23a   : > { %1465 = vsyncadd (!%p1348_p4), %s1173_s30, 4294966784  ;;  %p15_p5 = scmp.ge.s32.totalorder %s1540_s24, 4   ;;  %s1830_s18 = smov %s1472_s19 }
 0x23b   : > { %s1831_s19 = smov %s1476_s20  ;;  %s1832_s20 = smov %s1553_s27 }
 0x23c   : > { %s1833_s21 = smov %s1540_s24  ;;  %17 = sbr.rel (!%p15_p5) target bundleno = 3 (0x3), region = 134 }
 0x243   :  { %1178 = vsyncpa [#allocation4], 1 }
 0x244   :  { %1180 = vsyncpa [#allocation4 + $0x1], 1 }

</bundles_post_ra>
